<compile_context>
chip_gen: v7x
topology: tpu7x:2x2x1
jax: 0.10.0
libtpu: 0.0.40
codegen_flags: <defaults>
</compile_context>

<pallas_src>
import functools

import jax
import jax.numpy as jnp
from jax.experimental import pallas as pl
from jax.experimental.pallas import tpu as pltpu


def _round_up(x, m):
    return (x + m - 1) // m * m


def _pick_tile(size, base, align, floor):
    """Pick a tile (multiple of `align`, <= base) minimizing the padded extent."""
    padded_full = _round_up(size, align)
    if padded_full <= base:
        return padded_full  # whole (padded) dim fits in a single tile
    floor = max(floor, align)
    best_t, best_pad = base, _round_up(size, base)
    t = base
    while t >= floor:
        pad = _round_up(size, t)
        if pad < best_pad:  # strictly better -> keeps the largest tile on ties
            best_t, best_pad = t, pad
        t //= 2
    return best_t


def _mlp_kernel(x_ref, w_ref, b_ref, o_ref, *, precision):
    k = pl.program_id(2)

    # The f32 output tile is the resident accumulator for this (i, j) block
    # across all k steps; fold the bias add into its initialization.
    @pl.when(k == 0)
    def _():
        o_ref[...] = jnp.broadcast_to(b_ref[...], o_ref.shape).astype(o_ref.dtype)

    # MXU matmul with f32 accumulation directly into the output tile.
    o_ref[...] += jnp.dot(
        x_ref[...],
        w_ref[...],
        preferred_element_type=jnp.float32,
        precision=precision,
    )


def mlp_layer(x, w, b, *, tm=None, tn=None, tk=None, use_bf16_mxu=True):
    """nn.Linear forward: y = x @ w + b.

    x: (N, in_feats)
    w: (in_feats, H)   (transposed PyTorch weight)
    b: (H,)
    returns (N, H) in x.dtype
    """
    N, K = x.shape
    Kw, H = w.shape
    assert Kw == K and b.shape == (H,)

    # ---- chip-aware defaults ------------------------------------------------
    try:
        vmem_cap = int(pltpu.get_tpu_info().vmem_capacity_bytes)
    except Exception:
        vmem_cap = 64 << 20  # conservative fallback (v7x per-core VMEM)

    in_dtype = jnp.bfloat16 if use_bf16_mxu else jnp.float32
    in_bytes = 2 if use_bf16_mxu else 4
    sub_align = 16 if use_bf16_mxu else 8  # sublane packing of the operands

    # 1024-tiles are past the compute/bandwidth crossover on v5e/v6e/v7x and
    # fit comfortably in VMEM when double-buffered (bf16 inputs, f32 output).
    base_mn, base_k = 1024, 1024
    tm = tm or _pick_tile(N, base_mn, sub_align, 256)
    tn = tn or _pick_tile(H, base_mn, 128, 256)
    tk = tk or _pick_tile(K, base_k, 128, 256)

    Mp, Kp, Hp = _round_up(N, tm), _round_up(K, tk), _round_up(H, tn)

    # Small-VMEM parts (v7x, 64 MiB) have 2 TensorCores: make sure there are
    # at least 2 parallel (i, j) grid points so both cores get work.
    if vmem_cap <= (64 << 20) and (Mp // tm) * (Hp // tn) == 1:
        if tn >= 256 and tn % 256 == 0:
            tn //= 2
        elif tm >= 2 * sub_align and tm % (2 * sub_align) == 0:
            tm //= 2

    # ---- pad + pre-cast operands (bf16 halves HBM traffic & VMEM) -----------
    xp = jnp.pad(x, ((0, Mp - N), (0, Kp - K))) if (Mp, Kp) != (N, K) else x
    wp = jnp.pad(w, ((0, Kp - K), (0, Hp - H))) if (Kp, Hp) != (K, H) else w
    xp = xp.astype(in_dtype)
    wp = wp.astype(in_dtype)
    bp = (jnp.pad(b, (0, Hp - H)) if Hp != H else b).astype(jnp.float32).reshape(1, Hp)

    grid = (Mp // tm, Hp // tn, Kp // tk)
    grid_k = grid[2]
    total_steps = grid[0] * grid[1] * grid_k

    # Deeper input buffering only pays when there are too few k-steps to hide
    # the tile DMAs but other grid steps exist to overlap with.
    xw_bufs = 3 if (grid_k <= 2 and total_steps >= 4) else 2
    if xw_bufs == 2:
        x_spec = pl.BlockSpec((tm, tk), lambda i, j, k: (i, k))
        w_spec = pl.BlockSpec((tk, tn), lambda i, j, k: (k, j))
    else:
        x_spec = pl.BlockSpec((tm, tk), lambda i, j, k: (i, k),
                              pipeline_mode=pl.Buffered(xw_bufs))
        w_spec = pl.BlockSpec((tk, tn), lambda i, j, k: (k, j),
                              pipeline_mode=pl.Buffered(xw_bufs))
    b_spec = pl.BlockSpec((1, tn), lambda i, j, k: (0, j))
    o_spec = pl.BlockSpec((tm, tn), lambda i, j, k: (i, j))

    precision = None if use_bf16_mxu else jax.lax.Precision.HIGHEST
    kernel = functools.partial(_mlp_kernel, precision=precision)

    # Scheduling hint for XLA around the custom call.
    cost = pl.CostEstimate(
        flops=2 * Mp * Kp * Hp,
        transcendentals=0,
        bytes_accessed=in_bytes * (Mp * Kp + Kp * Hp) + 4 * (Hp + Mp * Hp),
    )

    # Chip-aware VMEM budget: multi-buffered input tiles + double-buffered
    # f32 output tile + bias, clamped to physical capacity minus headroom for
    # Mosaic internal scratch.
    vmem_bytes = (xw_bufs * (tm * tk + tk * tn) * in_bytes
                  + 2 * tn * 4
                  + 2 * tm * tn * 4)
    headroom = 12 << 20
    vmem_limit = int(min(max(vmem_bytes + (4 << 20), 16 << 20),
                         vmem_cap - headroom))

    out = pl.pallas_call(
        kernel,
        out_shape=jax.ShapeDtypeStruct((Mp, Hp), jnp.float32),
        grid_spec=pltpu.PrefetchScalarGridSpec(
            num_scalar_prefetch=0,
            grid=grid,
            in_specs=[x_spec, w_spec, b_spec],
            out_specs=o_spec,
        ),
        compiler_params=pltpu.CompilerParams(
            dimension_semantics=("parallel", "parallel", "arbitrary"),
            vmem_limit_bytes=vmem_limit,
        ),
        cost_estimate=cost,
    )(xp, wp, bp)

    return out[:N, :H].astype(x.dtype)


if __name__ == "__main__":
    # Shapes implied by the module: Linear(in_feats -> hidden_dim).
    N, in_feats, hidden_dim = 8, 32, 64

    key = jax.random.PRNGKey(0)
    kx, kw, kb = jax.random.split(key, 3)

    # Mimic PyTorch's uniform(-1/sqrt(fan_in), +1/sqrt(fan_in)) init.
    bound = 1.0 / jnp.sqrt(jnp.float32(in_feats))
    w_pt = jax.random.uniform(kw, (hidden_dim, in_feats), jnp.float32, -bound, bound)
    b_pt = jax.random.uniform(kb, (hidden_dim,), jnp.float32, -bound, bound)
    x = jax.random.normal(kx, (N, in_feats), jnp.float32)

    w = w_pt.T  # (in_feats, hidden_dim)

    # bf16-operand / f32-accumulate path (default, MXU-native).
    y = mlp_layer(x, w, b_pt)
    y = jax.block_until_ready(y)

    # Reference with the same bf16 operand rounding (f32 accumulate) -> tight check.
    xb = x.astype(jnp.bfloat16).astype(jnp.float32)
    wb = w.astype(jnp.bfloat16).astype(jnp.float32)
    y_ref_bf16 = jnp.dot(xb, wb, precision=jax.lax.Precision.HIGHEST) + b_pt
    # Full-f32 reference (nn.Linear semantics) -> loose sanity check.
    y_ref_f32 = jnp.dot(x, w, precision=jax.lax.Precision.HIGHEST) + b_pt

    assert y.shape == (N, hidden_dim)
    assert jnp.allclose(y, y_ref_bf16, atol=1e-4, rtol=1e-4)
    assert jnp.allclose(y, y_ref_f32, atol=5e-2, rtol=5e-2)

    # True-f32 path (precision=HIGHEST on the MXU) -> tight check vs f32 reference.
    y_f32 = jax.block_until_ready(mlp_layer(x, w, b_pt, use_bf16_mxu=False))
    assert jnp.allclose(y_f32, y_ref_f32, atol=1e-4, rtol=1e-4)

    print("KERNEL_OK")
</pallas_src>

<mosaic_0001>
module attributes {stable_mosaic.version = 11 : i64} {
  func.func @_mlp_kernel(%arg0: i32, %arg1: i32, %arg2: i32, %arg3: memref<16x128xbf16, #tpu.memory_space<vmem>>, %arg4: memref<128x128xbf16, #tpu.memory_space<vmem>>, %arg5: memref<1x128xf32, #tpu.memory_space<vmem>>, %arg6: memref<16x128xf32, #tpu.memory_space<vmem>>) attributes {dimension_semantics = [#tpu.dimension_semantics<parallel>, #tpu.dimension_semantics<parallel>, #tpu.dimension_semantics<arbitrary>], iteration_bounds = array<i64: 1, 1, 1>, scalar_prefetch = 0 : i64, scratch_operands = 0 : i64, tpu.core_type = #tpu.core_type<tc>, window_params = [{transform_indices = @transform_0, window_bounds = array<i64: 16, 128>}, {transform_indices = @transform_1, window_bounds = array<i64: 128, 128>}, {transform_indices = @transform_2, window_bounds = array<i64: 1, 128>}, {transform_indices = @transform_3, window_bounds = array<i64: 16, 128>}]} {
    %c0_i32 = arith.constant 0 : i32
    %0 = arith.cmpi eq, %arg2, %c0_i32 : i32
    %1 = arith.extui %0 : i1 to i32
    %c0_i32_0 = arith.constant 0 : i32
    %2 = arith.cmpi ne, %1, %c0_i32_0 : i32
    scf.if %2 {
      %c0_8 = arith.constant 0 : index
      %c0_9 = arith.constant 0 : index
      %9 = vector.load %arg5[%c0_8, %c0_9] : memref<1x128xf32, #tpu.memory_space<vmem>>, vector<1x128xf32>
      %10 = vector.shape_cast %9 : vector<1x128xf32> to vector<1x128xf32>
      %11 = vector.broadcast %10 : vector<1x128xf32> to vector<16x128xf32>
      %c0_10 = arith.constant 0 : index
      %c0_11 = arith.constant 0 : index
      %12 = vector.load %arg6[%c0_10, %c0_11] : memref<16x128xf32, #tpu.memory_space<vmem>>, vector<16x128xf32>
      tpu.vector_store %arg6[%c0_10, %c0_11], %11 {strides = array<i32>} : memref<16x128xf32, #tpu.memory_space<vmem>>, vector<16x128xf32>,
    } else {
    }
    %c0 = arith.constant 0 : index
    %c0_1 = arith.constant 0 : index
    %3 = vector.load %arg6[%c0, %c0_1] : memref<16x128xf32, #tpu.memory_space<vmem>>, vector<16x128xf32>
    %c0_2 = arith.constant 0 : index
    %c0_3 = arith.constant 0 : index
    %4 = vector.load %arg3[%c0_2, %c0_3] : memref<16x128xbf16, #tpu.memory_space<vmem>>, vector<16x128xbf16>
    %c0_4 = arith.constant 0 : index
    %c0_5 = arith.constant 0 : index
    %5 = vector.load %arg4[%c0_4, %c0_5] : memref<128x128xbf16, #tpu.memory_space<vmem>>, vector<128x128xbf16>
    %cst = arith.constant dense<0.000000e+00> : vector<16x128xf32>
    %6 = tpu.matmul %4, %5, %cst {dimension_numbers = #tpu.dot_dimension_numbers<[1], [0], [0], [1], [0, 0, 1, 1], [], []>} : vector<16x128xbf16>, vector<128x128xbf16>, vector<16x128xf32> -> vector<16x128xf32>
    %7 = arith.addf %3, %6 : vector<16x128xf32>
    %c0_6 = arith.constant 0 : index
    %c0_7 = arith.constant 0 : index
    %8 = vector.load %arg6[%c0_6, %c0_7] : memref<16x128xf32, #tpu.memory_space<vmem>>, vector<16x128xf32>
    tpu.vector_store %arg6[%c0_6, %c0_7], %7 {strides = array<i32>} : memref<16x128xf32, #tpu.memory_space<vmem>>, vector<16x128xf32>,
    return
  }
  func.func @transform_0(%arg0: i32, %arg1: i32, %arg2: i32) -> (i32, i32) {
    %c0_i32 = arith.constant 0 : i32
    return %arg0, %arg2 : i32, i32
  }
  func.func @transform_1(%arg0: i32, %arg1: i32, %arg2: i32) -> (i32, i32) {
    %c0_i32 = arith.constant 0 : i32
    return %arg2, %arg1 : i32, i32
  }
  func.func @transform_2(%arg0: i32, %arg1: i32, %arg2: i32) -> (i32, i32) {
    %c0_i32 = arith.constant 0 : i32
    %c0_i32_0 = arith.constant 0 : i32
    return %c0_i32, %arg1 : i32, i32
  }
  func.func @transform_3(%arg0: i32, %arg1: i32, %arg2: i32) -> (i32, i32) {
    %c0_i32 = arith.constant 0 : i32
    return %arg0, %arg1 : i32, i32
  }
}

</mosaic_0001>

<bundles_post_ra>
// kernel: tpu_custom_call.1
= control target key start
LH: loop header
LB: loop body
LE: loop exit
PB: predicated region body
PF: predicated region fallthrough
CT: control target
= control target key end

     0   :  { %8 = vsyncpa [#allocation3], 0  ;;  %s391_s0 = inlined_call_operand.hbm [shape: bf16[16,128], index: 0, kind: input, shape index: {}]   ;;  %s392_s1 = inlined_call_operand.hbm [shape: bf16[128,128], index: 1, kind: input, shape index: {}]   ;;  %s393_s2 = inlined_call_operand.vmem [shape: f32[1,128], index: 2, kind: input, shape index: {}]   ;;  %s394_s3 = inlined_call_operand.hbm [shape: f32[16,128], index: 3, kind: output, shape index: {}]  }
   0x1   :  { %9 = vsyncpa [#allocation6], 0 }
   0x2   :  { %10 = vsyncpa [#allocation4], 0  ;;  %s323_s12 = smov [#allocation2]   ;;  %s251_s16 = scalar_lea.hbm %s391_s0, 128 }
   0x3   :  { %s16_s13 = sshll.u32 %s323_s12, 4  ;;  %p252_p0 = scmp.ne.s32.totalorder %s391_s0, %s251_s16  ;;  %s17_s13 = int_to_ptr.vmem [resolvable:$true] %s16_s13 }
   0x4   :  { %p255_p1 = scmp.lt.u32.totalorder %s251_s16, %s391_s0 }
   0x6   :  { %p257_p2 = pnand %p255_p1, %p252_p0 }
   0x8   :  { %260 = shalt.err (!%p257_p2)
}
   0x9   :  { %s261_s21 = scalar_lea.vmem %s17_s13, 128  ;;  %p266_p4 = scmp.lt.s32.totalorder %s17_s13, %s17_s13 }
   0xa   :  { %p262_p3 = scmp.ne.s32.totalorder %s17_s13, %s261_s21  ;;  %p267_p5 = scmp.lt.s32.totalorder %s261_s21, %s261_s21 }
   0xc   :  { %p268_p6 = por %p267_p5, %p266_p4 }
   0xe   :  { %p269_p7 = pnand %p268_p6, %p262_p3 }
  0x10   :  { %272 = shalt.err (!%p269_p7)
}
  0x11   :  { %s324_s22 = smov 64   ;;  %s325_s23 = smov 4  }
  0x12   :  { %22 = dma.hbm_to_vmem [thread:$0]  %s391_s0, 128, %s17_s13, [#allocation3], %s324_s22, %s324_s22, %s325_s23  }
  0x13   :  { %s326_s26 = smov [#allocation5]   ;;  %s273_s30 = scalar_lea.hbm %s392_s1, 1024 }
  0x14   :  { %s28_s27 = sshll.u32 %s326_s26, 4  ;;  %p274_p8 = scmp.ne.s32.totalorder %s392_s1, %s273_s30  ;;  %s29_s27 = int_to_ptr.vmem [resolvable:$true] %s28_s27 }
  0x15   :  { %p277_p9 = scmp.lt.u32.totalorder %s273_s30, %s392_s1 }
  0x17   :  { %p279_p10 = pnand %p277_p9, %p274_p8 }
  0x19   :  { %282 = shalt.err (!%p279_p10)
}
  0x1a   :  { %s283_s8 = scalar_lea.vmem %s29_s27, 1024  ;;  %p288_p12 = scmp.lt.s32.totalorder %s29_s27, %s29_s27 }
  0x1b   :  { %p284_p11 = scmp.ne.s32.totalorder %s29_s27, %s283_s8  ;;  %p289_p13 = scmp.lt.s32.totalorder %s283_s8, %s283_s8 }
  0x1d   :  { %p290_p0 = por %p289_p13, %p288_p12 }
  0x1f   :  { %p291_p1 = pnand %p290_p0, %p284_p11 }
  0x21   :  { %294 = shalt.err (!%p291_p1)
}
  0x22   :  { %34 = dma.hbm_to_vmem [thread:$0]  %s392_s1, 1024, %s29_s27, [#allocation6], %s324_s22, %s324_s22, %s325_s23  }
  0x23   :  { %317 = dma.done.wait [#allocation3], 128  }
  0x24   :  { %318 = vsyncadd [#allocation3], 4294967168 }
  0x25   :  { %319 = dma.done.wait [#allocation6], 1024  }
  0x26   :  { %320 = vsyncadd [#allocation6], 4294966272  ;;  %v327_v0 = vmov 0.0   ;;  %vm328_vm0 = vmmov 0   ;;  %v242_v1 = vld [vmem:[#allocation5] sm:$0xff]   ;;  %v243_v2 = vld [vmem:[#allocation5 + $0x8] sm:$0xff]  }
  0x27   :  { %213 = vmatprep.subr.bf16.mxu0 %v327_v0  ;;  %229 = vmatprep.mubr.msk.bf16.mxu0 %vm328_vm0, %v327_v0  ;;  %v244_v3 = vld [vmem:[#allocation5 + $0x10] sm:$0xff]   ;;  %v245_v4 = vld [vmem:[#allocation5 + $0x18] sm:$0xff]   ;;  %v246_v5 = vld [vmem:[#allocation5 + $0x20] sm:$0xff]   ;;  %s329_s11 = smov [#allocation7]  }
  0x28   :  { %214 = vmatpush3.bf16.msra.mxu0 %v242_v1  ;;  %v247_v6 = vld [vmem:[#allocation5 + $0x28] sm:$0xff]   ;;  %v248_v7 = vld [vmem:[#allocation5 + $0x30] sm:$0xff]   ;;  %v249_v8 = vld [vmem:[#allocation5 + $0x38] sm:$0xff]   ;;  %s181_s12 = sshll.u32 %s329_s11, 4  ;;  %s182_s12 = int_to_ptr.vmem [resolvable:$true] %s181_s12 }
  0x29   :  { %215 = vmatprep.subr.bf16.mxu0 %v327_v0  ;;  %v250_v9 = vld [vmem:[#allocation2] sm:$0xff]   ;;  %s295_s13 = scalar_lea.vmem %s182_s12, 256  ;;  %p300_p3 = scmp.lt.s32.totalorder %s182_s12, %s182_s12 }
  0x2a   :  { %v194_v10 = vld [vmem:[%s393_s2] ss:$0 sm:$0xff]  ;;  %p296_p2 = scmp.ne.s32.totalorder %s182_s12, %s295_s13  ;;  %p301_p4 = scmp.lt.s32.totalorder %s295_s13, %s295_s13 }
  0x2c   :  { %216 = vmatpush3.bf16.msra.mxu0 %v243_v2  ;;  %p302_p5 = por %p301_p4, %p300_p3 }
  0x2d   :  { %217 = vmatprep.subr.bf16.mxu0 %v327_v0 }
  0x2e   :  { %p303_p6 = pnand %p302_p5, %p296_p2 }
  0x30   :  { %218 = vmatpush3.bf16.msra.mxu0 %v244_v3 }
  0x31   :  { %219 = vmatprep.subr.bf16.mxu0 %v327_v0 }
  0x34   :  { %220 = vmatpush3.bf16.msra.mxu0 %v245_v4 }
  0x35   :  { %221 = vmatprep.subr.bf16.mxu0 %v327_v0 }
  0x38   :  { %222 = vmatpush3.bf16.msra.mxu0 %v246_v5 }
  0x39   :  { %223 = vmatprep.subr.bf16.mxu0 %v327_v0 }
  0x3c   :  { %224 = vmatpush3.bf16.msra.mxu0 %v247_v6 }
  0x3d   :  { %225 = vmatprep.subr.bf16.mxu0 %v327_v0 }
  0x40   :  { %226 = vmatpush3.bf16.msra.mxu0 %v248_v7 }
  0x41   :  { %227 = vmatprep.subr.bf16.mxu0 %v327_v0 }
  0x44   :  { %228 = vmatpush3.bf16.msra.mxu0 %v249_v8 }
  0x47   :  { %230 = vmatmul.mubr.bf16.vlgmr.msra.gmra.mrb[0].mxu0 %v250_v9 }
 0x11a   :  { %v165_v11 = vpop.f32.mrb[0].mxu0 }
 0x11b   :  { %v172_v12 = vadd.f32 %v194_v10, %v165_v11  ;;  %v231_v13 = vpop.f32.mrb[1].mxu0 }
 0x11c   :  { %v168_v14 = vpop.f32.mrb[2].mxu0 }
 0x11d   :  { %174 = vst [vmem:[#allocation7] sm:$0xff] %v172_v12  ;;  %v173_v15 = vadd.f32 %v194_v10, %v168_v14  ;;  %v232_v16 = vpop.f32.mrb[3].mxu0 }
 0x11f   :  { %175 = vst [vmem:[#allocation7 + $0x8] sm:$0xff] %v173_v15 }
 0x120   :  { %306 = shalt.err (!%p303_p6)
}
 0x121   :  { %s307_s15 = scalar_lea.hbm %s394_s3, 256 }
 0x122   :  { %p308_p7 = scmp.ne.s32.totalorder %s394_s3, %s307_s15  ;;  %p311_p8 = scmp.lt.u32.totalorder %s307_s15, %s394_s3 }
 0x124   :  { %p313_p9 = pnand %p311_p8, %p308_p7 }
 0x126   :  { %316 = shalt.err (!%p313_p9)
}
 0x127   :  { %s330_s20 = smov 128   ;;  %s331_s21 = smov 8  }
 0x128   :  { %187 = dma.vmem_to_hbm [thread:$0]  %s182_s12, 256, %s394_s3, [#allocation4], %s330_s20, %s330_s20, %s331_s21  }
 0x129   :  { %321 = dma.done.wait [#allocation4], 256  }
 0x12a   :  { %322 = vsyncadd [#allocation4], 4294967040 }
 0x12b   :  { %191 = vsyncpa [#allocation3], 1 }
 0x12c   :  { %192 = vsyncpa [#allocation6], 1 }
 0x12d   :  { %193 = vsyncpa [#allocation4], 1 }

</bundles_post_ra>
